<compile_context>
chip_gen: v5e
topology: v5e:2x2
jax: 0.10.0
libtpu: 0.0.40
codegen_flags: <defaults>
</compile_context>

<pallas_src>
import functools

import jax
import jax.numpy as jnp
from jax import lax
from jax.experimental import pallas as pl
from jax.experimental.pallas import tpu as pltpu


def _round_up(a: int, m: int) -> int:
    return ((a + m - 1) // m) * m


def _neumiss_kernel(x_ref, mu_ref, wt_ref, o_ref, *, depth):
    x = x_ref[...]                                           # (TB, Fp) f32, may hold NaNs
    isnan = jnp.isnan(x)
    not_mask = jnp.logical_not(isnan).astype(jnp.float32)    # ~mask as 0/1 float
    x0 = jnp.where(isnan, jnp.zeros_like(x), x)              # nan_to_num
    h0 = x0 - not_mask * mu_ref[...]                         # mu broadcast over batch

    # Hoist the (pre-transposed) weight load out of the depth recurrence.
    wt = wt_ref[...]                                         # (Fp, Fp): h @ wt == h @ W.T

    def body(_, h):
        y = jnp.dot(h, wt, preferred_element_type=jnp.float32)  # MXU, f32 accumulate
        return not_mask * y + h0                                 # mask nonlinearity + skip

    # Small static depth: unroll for LLO visibility (overlap VPU of iter i
    # with MXU pushes of iter i+1).
    h = lax.fori_loop(0, depth, body, h0, unroll=True)
    o_ref[...] = h.astype(o_ref.dtype)


def neumiss_block(x, mu, w, depth, *, batch_tile=1024):
    """x: (B, F) float32 with NaNs marking missing values.
    mu: (F,) float32. w: (F, F) float32 (nn.Linear weight, y = h @ W.T).
    Returns (B, F) float32."""
    B, F = x.shape
    x = x.astype(jnp.float32)
    mu = mu.astype(jnp.float32)
    w = w.astype(jnp.float32)

    # --- lane-dense feature padding (multiple of 128) ------------------------
    Fp = _round_up(max(F, 128), 128)

    # --- batch tile: multiple of 8 sublanes, capped, shrunk to fit budget ----
    vmem_budget = 48 * 1024 * 1024       # scoped VMEM we ask the compiler for
    TB = min(batch_tile, _round_up(B, 8))
    TB = max(8, (TB // 8) * 8)
    # double-buffered x + out tiles, plus resident weight + mu, + live h/h0/mask
    def _tile_bytes(tb):
        return (4 * tb * Fp            # 2x double-buffered x
                + 4 * tb * Fp          # 2x double-buffered out
                + 2 * Fp * Fp          # weight (double-buffered once)
                + 4 * tb * Fp) * 4     # live h, h0, not_mask, y (f32)
    while TB > 8 and _tile_bytes(TB) > vmem_budget:
        TB = max(8, (TB // 2 // 8) * 8)
    Bp = _round_up(B, TB)

    # Padding is inert: padded feature columns of mu/W are zero, so padded
    # lanes of h stay zero across iterations; padded batch rows are sliced off.
    x_p = jnp.pad(x, ((0, Bp - B), (0, Fp - F)))
    mu_p = jnp.pad(mu, (0, Fp - F)).reshape(1, Fp)
    wt_p = jnp.pad(w, ((0, Fp - F), (0, Fp - F))).T          # pre-transpose: h @ wt

    kernel = functools.partial(_neumiss_kernel, depth=depth)

    cost = pl.CostEstimate(
        flops=2 * depth * Bp * Fp * Fp,
        transcendentals=0,
        bytes_accessed=4 * (2 * Bp * Fp + Fp * Fp + Fp),
    )

    out_p = pl.pallas_call(
        kernel,
        out_shape=jax.ShapeDtypeStruct((Bp, Fp), jnp.float32),
        grid_spec=pltpu.PrefetchScalarGridSpec(
            num_scalar_prefetch=0,
            grid=(Bp // TB,),
            in_specs=[
                pl.BlockSpec((TB, Fp), lambda i: (i, 0)),    # x: tiled over batch
                pl.BlockSpec((1, Fp), lambda i: (0, 0)),     # mu: grid-invariant
                pl.BlockSpec((Fp, Fp), lambda i: (0, 0)),    # W.T: grid-invariant (resident)
            ],
            out_specs=pl.BlockSpec((TB, Fp), lambda i: (i, 0)),
        ),
        compiler_params=pltpu.CompilerParams(
            dimension_semantics=("parallel",),               # batch rows independent
            vmem_limit_bytes=vmem_budget + (16 << 20),
        ),
        cost_estimate=cost,
    )(x_p, mu_p, wt_p)

    return out_p[:B, :F]


def neumiss_reference(x, mu, w, depth):
    """Pure-JAX reference mirroring the PyTorch forward exactly."""
    x = x.astype(jnp.float32)
    isnan = jnp.isnan(x)
    not_mask = (~isnan).astype(jnp.float32)
    x0 = jnp.nan_to_num(x)
    h0 = x0 - not_mask * mu[None, :]
    h = h0
    for _ in range(depth):
        h = h @ w.T
        h = not_mask * h
        h = h + h0
    return h


if __name__ == "__main__":
    B, F, depth = 8, 32, 3

    key = jax.random.PRNGKey(0)
    k_x, k_mu, k_w, k_nan = jax.random.split(key, 4)

    # Input with missing values (NaNs), deterministic pattern.
    x = jax.random.normal(k_x, (B, F), dtype=jnp.float32)
    nan_mask = jax.random.bernoulli(k_nan, p=0.3, shape=(B, F))
    x = jnp.where(nan_mask, jnp.nan, x)

    # Parameters, matching reset_parameters():
    #   mu ~ Normal(0, 1)
    mu = jax.random.normal(k_mu, (F,), dtype=jnp.float32)
    #   W ~ xavier_uniform with gain=0.5: U(-a, a), a = gain*sqrt(6/(fan_in+fan_out))
    bound = 0.5 * (6.0 / (F + F)) ** 0.5
    w = jax.random.uniform(k_w, (F, F), dtype=jnp.float32,
                           minval=-bound, maxval=bound)

    out = neumiss_block(x, mu, w, depth)
    out = jax.block_until_ready(out)

    ref = neumiss_reference(x, mu, w, depth)
    assert out.shape == (B, F)
    assert jnp.allclose(out, ref, atol=1e-5, rtol=1e-5)
    print("KERNEL_OK")
</pallas_src>

<mosaic_0001>
module attributes {stable_mosaic.version = 11 : i64} {
  func.func @_neumiss_kernel(%arg0: i32, %arg1: memref<8x128xf32, #tpu.memory_space<vmem>>, %arg2: memref<1x128xf32, #tpu.memory_space<vmem>>, %arg3: memref<128x128xf32, #tpu.memory_space<vmem>>, %arg4: memref<8x128xf32, #tpu.memory_space<vmem>>) attributes {dimension_semantics = [#tpu.dimension_semantics<parallel>], iteration_bounds = array<i64: 1>, scalar_prefetch = 0 : i64, scratch_operands = 0 : i64, tpu.core_type = #tpu.core_type<tc>, window_params = [{transform_indices = @transform_0, window_bounds = array<i64: 8, 128>}, {pipeline_mode = #tpu.pipeline_mode<synchronous>, transform_indices = @transform_1, window_bounds = array<i64: 1, 128>}, {pipeline_mode = #tpu.pipeline_mode<synchronous>, transform_indices = @transform_2, window_bounds = array<i64: 128, 128>}, {transform_indices = @transform_3, window_bounds = array<i64: 8, 128>}]} {
    %c0 = arith.constant 0 : index
    %c0_0 = arith.constant 0 : index
    %0 = vector.load %arg1[%c0, %c0_0] : memref<8x128xf32, #tpu.memory_space<vmem>>, vector<8x128xf32>
    %1 = arith.cmpf one, %0, %0 : vector<8x128xf32>
    %cst = arith.constant dense<true> : vector<8x128xi1>
    %2 = arith.xori %1, %cst : vector<8x128xi1>
    %3 = arith.extui %2 : vector<8x128xi1> to vector<8x128xi32>
    %4 = arith.sitofp %3 : vector<8x128xi32> to vector<8x128xf32>
    %cst_1 = arith.constant 0.000000e+00 : f32
    %5 = vector.broadcast %cst_1 : f32 to vector<8x128xf32>
    %6 = arith.select %1, %5, %0 : vector<8x128xi1>, vector<8x128xf32>
    %c0_2 = arith.constant 0 : index
    %c0_3 = arith.constant 0 : index
    %7 = vector.load %arg2[%c0_2, %c0_3] : memref<1x128xf32, #tpu.memory_space<vmem>>, vector<1x128xf32>
    %8 = vector.broadcast %7 : vector<1x128xf32> to vector<8x128xf32>
    %9 = arith.mulf %4, %8 : vector<8x128xf32>
    %10 = arith.subf %6, %9 : vector<8x128xf32>
    %c0_4 = arith.constant 0 : index
    %c0_5 = arith.constant 0 : index
    %11 = vector.load %arg3[%c0_4, %c0_5] : memref<128x128xf32, #tpu.memory_space<vmem>>, vector<128x128xf32>
    %c0_i32 = arith.constant 0 : i32
    %cst_6 = arith.constant dense<0.000000e+00> : vector<8x128xf32>
    %12 = tpu.matmul %10, %11, %cst_6 {dimension_numbers = #tpu.dot_dimension_numbers<[1], [0], [0], [1], [0, 0, 1, 1], [], []>} : vector<8x128xf32>, vector<128x128xf32>, vector<8x128xf32> -> vector<8x128xf32>
    %13 = arith.mulf %4, %12 : vector<8x128xf32>
    %14 = arith.addf %13, %10 : vector<8x128xf32>
    %c1_i32 = arith.constant 1 : i32
    %cst_7 = arith.constant dense<0.000000e+00> : vector<8x128xf32>
    %15 = tpu.matmul %14, %11, %cst_7 {dimension_numbers = #tpu.dot_dimension_numbers<[1], [0], [0], [1], [0, 0, 1, 1], [], []>} : vector<8x128xf32>, vector<128x128xf32>, vector<8x128xf32> -> vector<8x128xf32>
    %16 = arith.mulf %4, %15 : vector<8x128xf32>
    %17 = arith.addf %16, %10 : vector<8x128xf32>
    %c2_i32 = arith.constant 2 : i32
    %cst_8 = arith.constant dense<0.000000e+00> : vector<8x128xf32>
    %18 = tpu.matmul %17, %11, %cst_8 {dimension_numbers = #tpu.dot_dimension_numbers<[1], [0], [0], [1], [0, 0, 1, 1], [], []>} : vector<8x128xf32>, vector<128x128xf32>, vector<8x128xf32> -> vector<8x128xf32>
    %19 = arith.mulf %4, %18 : vector<8x128xf32>
    %20 = arith.addf %19, %10 : vector<8x128xf32>
    %c0_9 = arith.constant 0 : index
    %c0_10 = arith.constant 0 : index
    %21 = vector.load %arg4[%c0_9, %c0_10] : memref<8x128xf32, #tpu.memory_space<vmem>>, vector<8x128xf32>
    tpu.vector_store %arg4[%c0_9, %c0_10], %20 {strides = array<i32>} : memref<8x128xf32, #tpu.memory_space<vmem>>, vector<8x128xf32>,
    return
  }
  func.func @transform_0(%arg0: i32) -> (i32, i32) {
    %c0_i32 = arith.constant 0 : i32
    %c0_i32_0 = arith.constant 0 : i32
    return %arg0, %c0_i32 : i32, i32
  }
  func.func @transform_1(%arg0: i32) -> (i32, i32) {
    %c0_i32 = arith.constant 0 : i32
    %c0_i32_0 = arith.constant 0 : i32
    %c0_i32_1 = arith.constant 0 : i32
    return %c0_i32, %c0_i32_0 : i32, i32
  }
  func.func @transform_2(%arg0: i32) -> (i32, i32) {
    %c0_i32 = arith.constant 0 : i32
    %c0_i32_0 = arith.constant 0 : i32
    %c0_i32_1 = arith.constant 0 : i32
    return %c0_i32, %c0_i32_0 : i32, i32
  }
  func.func @transform_3(%arg0: i32) -> (i32, i32) {
    %c0_i32 = arith.constant 0 : i32
    %c0_i32_0 = arith.constant 0 : i32
    return %arg0, %c0_i32 : i32, i32
  }
}

</mosaic_0001>

<bundles_post_ra>
// kernel: tpu_custom_call.1
= control target key start
LH: loop header
LB: loop body
LE: loop exit
PB: predicated region body
PF: predicated region fallthrough
CT: control target
= control target key end

     0   :  { %8 = vsyncpa [#allocation3], 0  ;;  %s325_s0 = inlined_call_operand.hbm [shape: f32[8,128], index: 0, kind: input, shape index: {}]   ;;  %s326_s1 = inlined_call_operand.hbm [shape: f32[1,128], index: 1, kind: input, shape index: {}]   ;;  %s327_s2 = inlined_call_operand.hbm [shape: f32[128,128], index: 2, kind: input, shape index: {}]   ;;  %s328_s3 = inlined_call_operand.hbm [shape: f32[8,128], index: 3, kind: output, shape index: {}]  }
   0x1   :  { %9 = vsyncpa [#allocation6], 0  ;;  %s27_s14 = sshll.u32 %s326_s1, 4  ;;  %s28_s14 = int_to_ptr.hbm [resolvable:$true] %s27_s14 }
   0x2   :  { %10 = vsyncpa [#allocation4], 0  ;;  %s283_s15 = smov [#allocation5]   ;;  %s16_s19 = sshll.u32 %s325_s0, 4  ;;  %s17_s19 = int_to_ptr.hbm [resolvable:$true] %s16_s19 }
   0x3   :  { %s29_s16 = sshll.u32 %s283_s15, 4  ;;  %s284_s20 = smov [#allocation2]   ;;  %s30_s16 = int_to_ptr.vmem [resolvable:$true] %s29_s16 }
   0x4   :  { %32 = dma.hbm_to_vmem [thread:$0]  %s28_s14, 16, %s30_s16, [#allocation6]  }
   0x5   :  { %s18_s21 = sshll.u32 %s284_s20, 4  ;;  %s37_s24 = sshll.u32 %s327_s2, 4  ;;  %s19_s21 = int_to_ptr.vmem [resolvable:$true] %s18_s21  ;;  %s38_s24 = int_to_ptr.hbm [resolvable:$true] %s37_s24 }
   0x6   :  { %21 = dma.hbm_to_vmem [thread:$0]  %s17_s19, 128, %s19_s21, [#allocation3]  }
   0x7   :  { %s285_s1 = smov [#allocation7]   ;;  %s286_s26 = smov 128  }
   0x8   :  { %s39_s25 = sshll.u32 %s285_s1, 4  ;;  %s287_s27 = smov 8   ;;  %s40_s25 = int_to_ptr.vmem [resolvable:$true] %s39_s25 }
   0x9   :  { %45 = dma.hbm_to_vmem [thread:$0]  %s38_s24, 2048, %s40_s25, [#allocation6], %s286_s26, %s286_s26, %s287_s27  }
   0xa   :  { %277 = dma.done.wait [#allocation3], 128  }
   0xb   :  { %278 = vsyncadd [#allocation3], 4294967168 }
   0xc   :  { %279 = dma.done.wait [#allocation6], 2064  }
   0xd   :  { %280 = vsyncadd [#allocation6], 4294965232  ;;  %v85_v0 = vld [vmem:[#allocation7 + $0x78] sm:$0xff]  ;;  %v84_v1 = vld [vmem:[#allocation7 + $0x70] sm:$0xff]  ;;  %vm288_vm1 = vmmov 1   ;;  %v289_v14 = vmov 0.0  }
   0xe   :  { %86 = vmatpush.msra.mxu0 %v85_v0  ;;  %108 = vmatpush.msra.mxu1 %v85_v0  ;;  %v83_v2 = vld [vmem:[#allocation7 + $0x68] sm:$0xff]  ;;  %v82_v3 = vld [vmem:[#allocation7 + $0x60] sm:$0xff]  ;;  %v81_v4 = vld [vmem:[#allocation7 + $0x58] sm:$0xff]  ;;  %s290_s0 = smov [#allocation8]   ;;  %s160_s30 = sshll.u32 %s328_s3, 4  ;;  %s161_s30 = int_to_ptr.hbm [resolvable:$true] %s160_s30 }
   0xf   :  { %130 = vmatpush.msra.mxu2 %v85_v0  ;;  %v80_v5 = vld [vmem:[#allocation7 + $0x50] sm:$0xff]  ;;  %v79_v6 = vld [vmem:[#allocation7 + $0x48] sm:$0xff]  ;;  %v78_v7 = vld [vmem:[#allocation7 + $0x40] sm:$0xff]  ;;  %s158_s2 = sshll.u32 %s290_s0, 4  ;;  %s159_s2 = int_to_ptr.vmem [resolvable:$true] %s158_s2 }
  0x10   :  { %87 = vmatpush.msra.mxu0 %v84_v1  ;;  %109 = vmatpush.msra.mxu1 %v84_v1  ;;  %v58_v8 = vld [vmem:[#allocation2] sm:$0xff]  ;;  %v75_v11 = vld [vmem:[#allocation7 + $0x28] sm:$0xff]  ;;  %v74_v12 = vld [vmem:[#allocation7 + $0x20] sm:$0xff] }
  0x11   :  { %131 = vmatpush.msra.mxu2 %v84_v1  ;;  %v77_v9 = vld [vmem:[#allocation7 + $0x38] sm:$0xff]  ;;  %vm59_vm0 = vcmp.ne.f32.partialorder %v58_v8, %v58_v8  ;;  %v76_v10 = vld [vmem:[#allocation7 + $0x30] sm:$0xff]  ;;  %v71_v20 = vld [vmem:[#allocation7 + $0x8] sm:$0xff] }
  0x12   :  { %88 = vmatpush.msra.mxu0 %v83_v2  ;;  %110 = vmatpush.msra.mxu1 %v83_v2  ;;  %vm60_vm2 = vmxor %vm59_vm0, %vm288_vm1  ;;  %v180_v13 = vld [vmem:[#allocation5] ss:$0 sm:$0xff]  ;;  %v72_v17 = vld [vmem:[#allocation7 + $0x10] sm:$0xff]  ;;  %v63_v19 = vsel %vm59_vm0, 0.0, %v58_v8 }
  0x13   :  { %132 = vmatpush.msra.mxu2 %v83_v2  ;;  %v171_v15 = vsel %vm60_vm2, 1.0, %v289_v14  ;;  %v73_v16 = vld [vmem:[#allocation7 + $0x18] sm:$0xff]  ;;  %v70_v21 = vld [vmem:[#allocation7] sm:$0xff] }
  0x14   :  { %89 = vmatpush.msra.mxu0 %v82_v3  ;;  %111 = vmatpush.msra.mxu1 %v82_v3  ;;  %v68_v18 = vmul.f32 %v180_v13, %v171_v15 }
  0x15   :  { %133 = vmatpush.msra.mxu2 %v82_v3 }
  0x16   :  { %90 = vmatpush.msra.mxu0 %v81_v4  ;;  %112 = vmatpush.msra.mxu1 %v81_v4  ;;  %v69_v22 = vsub.f32 %v63_v19, %v68_v18 }
  0x17   :  { %134 = vmatpush.msra.mxu2 %v81_v4 }
  0x18   :  { %91 = vmatpush.msra.mxu0 %v80_v5  ;;  %113 = vmatpush.msra.mxu1 %v80_v5 }
  0x19   :  { %135 = vmatpush.msra.mxu2 %v80_v5 }
  0x1a   :  { %92 = vmatpush.msra.mxu0 %v79_v6  ;;  %114 = vmatpush.msra.mxu1 %v79_v6 }
  0x1b   :  { %136 = vmatpush.msra.mxu2 %v79_v6 }
  0x1c   :  { %93 = vmatpush.msra.mxu0 %v78_v7  ;;  %115 = vmatpush.msra.mxu1 %v78_v7 }
  0x1d   :  { %137 = vmatpush.msra.mxu2 %v78_v7 }
  0x1e   :  { %94 = vmatpush.msra.mxu0 %v77_v9  ;;  %116 = vmatpush.msra.mxu1 %v77_v9 }
  0x1f   :  { %138 = vmatpush.msra.mxu2 %v77_v9 }
  0x20   :  { %95 = vmatpush.msra.mxu0 %v76_v10  ;;  %117 = vmatpush.msra.mxu1 %v76_v10 }
  0x21   :  { %139 = vmatpush.msra.mxu2 %v76_v10 }
  0x22   :  { %96 = vmatpush.msra.mxu0 %v75_v11  ;;  %118 = vmatpush.msra.mxu1 %v75_v11 }
  0x23   :  { %140 = vmatpush.msra.mxu2 %v75_v11 }
  0x24   :  { %97 = vmatpush.msra.mxu0 %v74_v12  ;;  %119 = vmatpush.msra.mxu1 %v74_v12 }
  0x25   :  { %141 = vmatpush.msra.mxu2 %v74_v12 }
  0x26   :  { %98 = vmatpush.msra.mxu0 %v73_v16  ;;  %120 = vmatpush.msra.mxu1 %v73_v16 }
  0x27   :  { %142 = vmatpush.msra.mxu2 %v73_v16 }
  0x28   :  { %99 = vmatpush.msra.mxu0 %v72_v17  ;;  %121 = vmatpush.msra.mxu1 %v72_v17 }
  0x29   :  { %143 = vmatpush.msra.mxu2 %v72_v17 }
  0x2a   :  { %100 = vmatpush.msra.mxu0 %v71_v20  ;;  %122 = vmatpush.msra.mxu1 %v71_v20 }
  0x2b   :  { %144 = vmatpush.msra.mxu2 %v71_v20 }
  0x2c   :  { %101 = vmatpush.msra.mxu0 %v70_v21  ;;  %123 = vmatpush.msra.mxu1 %v70_v21 }
  0x2d   :  { %102 = vmatmul.f32.vlgmr.msra.gmra.mxu0 %v69_v22  ;;  %145 = vmatpush.msra.mxu2 %v70_v21 }
  0xaa   :  { %v103_v23 = vpop.f32.mrf.mxu0 }
  0xab   :  { %v106_v24 = vmul.f32 %v171_v15, %v103_v23 }
  0xad   :  { %v107_v25 = vadd.f32 %v106_v24, %v69_v22 }
  0xaf   :  { %124 = vmatmul.f32.vlgmr.msra.gmra.mxu1 %v107_v25 }
 0x12c   :  { %v125_v26 = vpop.f32.mrf.mxu1 }
 0x12d   :  { %v128_v27 = vmul.f32 %v171_v15, %v125_v26 }
 0x12f   :  { %v129_v28 = vadd.f32 %v128_v27, %v69_v22 }
 0x131   :  { %146 = vmatmul.f32.vlgmr.msra.gmra.mxu2 %v129_v28 }
 0x1b4   :  { %v147_v29 = vpop.f32.mrf.mxu2 }
 0x1b5   :  { %v150_v30 = vmul.f32 %v171_v15, %v147_v29 }
 0x1b7   :  { %v151_v31 = vadd.f32 %v150_v30, %v69_v22 }
 0x1b9   :  { %152 = vst [vmem:[#allocation8] sm:$0xff] %v151_v31 }
 0x1ba   :  { %163 = dma.vmem_to_hbm [thread:$0]  %s159_s2, 128, %s161_s30, [#allocation4]  }
 0x1bb   :  { %281 = dma.done.wait [#allocation4], 128  }
 0x1bc   :  { %282 = vsyncadd [#allocation4], 4294967168 }
 0x1bd   :  { %168 = vsyncpa [#allocation3], 1 }
 0x1be   :  { %169 = vsyncpa [#allocation6], 1 }
 0x1bf   :  { %170 = vsyncpa [#allocation4], 1 }

</bundles_post_ra>
